<compile_context>
chip_gen: v7x
topology: tpu7x:2x2x1
jax: 0.10.0
libtpu: 0.0.40
codegen_flags: <defaults>
</compile_context>

<pallas_src>
import jax
import jax.numpy as jnp
from jax import lax
from jax.experimental import pallas as pl
from jax.experimental.pallas import tpu as pltpu


def _addmm_kernel(x1_ref, x2_ref, o_ref):
    # Single MXU matmul over the full (small) operands; f32 accumulate, precision
    # pinned so the bf16 pass count is identical on every TPU generation.
    o_ref[...] = jnp.dot(
        x1_ref[...],
        x2_ref[...],
        preferred_element_type=jnp.float32,
        precision=lax.Precision.HIGHEST,
    )


def model_forward(x1, x2):
    """v1 = x1 @ x2 (addmm with alpha=1, no bias); cat([v1], dim=1) == v1."""
    M, K = x1.shape
    K2, N = x2.shape
    assert K == K2, "inner dims must match"

    itemsize = jnp.dtype(jnp.float32).itemsize
    cost = pl.CostEstimate(
        flops=2 * M * N * K,
        transcendentals=0,
        bytes_accessed=(M * K + K * N + M * N) * itemsize,
    )

    return pl.pallas_call(
        _addmm_kernel,
        out_shape=jax.ShapeDtypeStruct((M, N), jnp.float32),
        in_specs=[
            pl.BlockSpec(memory_space=pltpu.MemorySpace.VMEM),
            pl.BlockSpec(memory_space=pltpu.MemorySpace.VMEM),
        ],
        out_specs=pl.BlockSpec(memory_space=pltpu.MemorySpace.VMEM),
        cost_estimate=cost,
    )(x1, x2)


def init_unused_conv_params(key):
    # Conv2d(3, 8, kernel_size=1, stride=1, padding=1) — defined in __init__,
    # unused in forward.  Deterministic init for completeness.
    kw, kb = jax.random.split(key)
    weight = jax.random.normal(kw, (8, 3, 1, 1), dtype=jnp.float32) * 0.1
    bias = jax.random.normal(kb, (8,), dtype=jnp.float32) * 0.1
    return weight, bias


if __name__ == "__main__":
    key = jax.random.PRNGKey(0)
    k1, k2, k3 = jax.random.split(key, 3)

    # Small matrix shapes consistent with a 2-D addmm (mat1 [M,K] @ mat2 [K,N]).
    M, K, N = 32, 64, 48
    x1 = jax.random.normal(k1, (M, K), dtype=jnp.float32)
    x2 = jax.random.normal(k2, (K, N), dtype=jnp.float32)

    _conv_w, _conv_b = init_unused_conv_params(k3)  # parameters exist but unused

    out = model_forward(x1, x2)
    jax.block_until_ready(out)

    # Sanity-check against plain JAX reference.
    ref = jnp.dot(x1, x2, precision=lax.Precision.HIGHEST)
    assert out.shape == (M, N), out.shape
    assert jnp.allclose(out, ref, atol=1e-4, rtol=1e-4), "mismatch vs reference"

    print("KERNEL_OK")
</pallas_src>

<mosaic_0001>
module attributes {stable_mosaic.version = 11 : i64} {
  func.func @_addmm_kernel(%arg0: memref<32x64xf32, #tpu.memory_space<vmem>>, %arg1: memref<64x48xf32, #tpu.memory_space<vmem>>, %arg2: memref<32x48xf32, #tpu.memory_space<vmem>>) attributes {dimension_semantics = [], scalar_prefetch = 0 : i64, scratch_operands = 0 : i64, tpu.core_type = #tpu.core_type<tc>} {
    %c0 = arith.constant 0 : index
    %c0_0 = arith.constant 0 : index
    %0 = vector.load %arg0[%c0, %c0_0] : memref<32x64xf32, #tpu.memory_space<vmem>>, vector<32x64xf32>
    %c0_1 = arith.constant 0 : index
    %c0_2 = arith.constant 0 : index
    %1 = vector.load %arg1[%c0_1, %c0_2] : memref<64x48xf32, #tpu.memory_space<vmem>>, vector<64x48xf32>
    %cst = arith.constant dense<0.000000e+00> : vector<32x48xf32>
    %2 = tpu.matmul %0, %1, %cst {dimension_numbers = #tpu.dot_dimension_numbers<[1], [0], [0], [1], [0, 0, 1, 1], [], []>, precision = #tpu.contract_precision<fp32>} : vector<32x64xf32>, vector<64x48xf32>, vector<32x48xf32> -> vector<32x48xf32>
    %c0_3 = arith.constant 0 : index
    %c0_4 = arith.constant 0 : index
    %3 = vector.load %arg2[%c0_3, %c0_4] : memref<32x48xf32, #tpu.memory_space<vmem>>, vector<32x48xf32>
    tpu.vector_store %arg2[%c0_3, %c0_4], %2 {strides = array<i32>} : memref<32x48xf32, #tpu.memory_space<vmem>>, vector<32x48xf32>,
    return
  }
}

</mosaic_0001>

<bundles_post_ra>
// kernel: tpu_custom_call.1
= control target key start
LH: loop header
LB: loop body
LE: loop exit
PB: predicated region body
PF: predicated region fallthrough
CT: control target
= control target key end

     0   :  { %vm24_vm0 = vcmask 523264   ;;  %s1265_s0 = inlined_call_operand.vmem [shape: f32[32,64], index: 0, kind: input, shape index: {}]   ;;  %s1266_s1 = inlined_call_operand.vmem [shape: f32[64,48], index: 1, kind: input, shape index: {}]   ;;  %s1267_s2 = inlined_call_operand.hbm [shape: f32[32,48], index: 2, kind: output, shape index: {}]  }
   0x1   :  { %v16_v0 = vld [vmem:[%s1266_s1] sm:$0xff]  ;;  %v17_v1 = vld [vmem:[%s1266_s1 + $0x8] sm:$0xff]  ;;  %v18_v2 = vld [vmem:[%s1266_s1 + $0x10] sm:$0xff] }
   0x2   :  { %v38_v3 = vand.u32 4294901760, %v16_v0  ;;  %v41_v4 = vand.u32 4294901760, %v17_v1  ;;  %v19_v5 = vld [vmem:[%s1266_s1 + $0x18] sm:$0xff]  ;;  %v44_v6 = vand.u32 4294901760, %v18_v2  ;;  %v20_v7 = vld [vmem:[%s1266_s1 + $0x20] sm:$0xff]  ;;  %v21_v8 = vld [vmem:[%s1266_s1 + $0x28] sm:$0xff] }
   0x3   :  { %v47_v9 = vand.u32 4294901760, %v19_v5  ;;  %v50_v10 = vand.u32 4294901760, %v20_v7  ;;  %v53_v11 = vand.u32 4294901760, %v21_v8  ;;  %v22_v12 = vld [vmem:[%s1266_s1 + $0x30] sm:$0xff]  ;;  %v1113_v13 = vld [vmem:[%s1266_s1 + $0x38] sm:$0xff]  ;;  %v12_v14 = vld [vmem:[%s1265_s0] sm:$0xff] }
   0x4   :  { %v1118_v15 = vpack.c.bf16 %v41_v4, %v38_v3  ;;  %v56_v16 = vand.u32 4294901760, %v22_v12  ;;  %v26_v17 = vsel %vm24_vm0, %v12_v14, 0  ;;  %v13_v18 = vld [vmem:[%s1265_s0 + $0x8] sm:$0xff]  ;;  %v59_v20 = vand.u32 4294901760, %v1113_v13 }
   0x5   :  { %v1124_v19 = vpack.c.bf16 %v47_v9, %v44_v6  ;;  %v1127_v21 = vand.u32 4294901760, %v26_v17  ;;  %v1129_v22 = vsub.f32 %v16_v0, %v38_v3 }
   0x6   :  { %7 = vsyncpa [#allocation3], 0  ;;  %929 = vmatprep.subr.bf16.mxu1 %v1118_v15  ;;  %977 = vmatprep.subr.bf16.mxu0 %v1118_v15  ;;  %v1133_v23 = vpack.c.bf16 %v53_v11, %v50_v10  ;;  %v1135_v24 = vsub.f32 %v17_v1, %v41_v4  ;;  %v29_v25 = vsel %vm24_vm0, %v13_v18, 0  ;;  %v1138_v26 = vsub.f32 %v18_v2, %v44_v6  ;;  %v14_v46 = vld [vmem:[%s1265_s0 + $0x10] sm:$0xff]  ;;  %v15_v52 = vld [vmem:[%s1265_s0 + $0x18] sm:$0xff]  ;;  %s1071_s0 = smov [#allocation2]  }
   0x7   :  { %931 = vmatpush3.bf16.msra.mxu1 %v1118_v15  ;;  %979 = vmatpush3.bf16.msra.mxu0 %v1118_v15  ;;  %v1143_v27 = vsub.f32 %v26_v17, %v1127_v21  ;;  %v153_v28 = vand.u32 4294901760, %v1129_v22  ;;  %v1146_v29 = vand.u32 4294901760, %v29_v25  ;;  %v1148_v30 = vsub.f32 %v19_v5, %v47_v9  ;;  %s713_s4 = sshll.u32 %s1071_s0, 4  ;;  %s714_s4 = int_to_ptr.vmem [resolvable:$true] %s713_s4 }
   0x8   :  { %933 = vmatprep.subr.bf16.mxu1 %v1124_v19  ;;  %981 = vmatprep.subr.bf16.mxu0 %v1124_v19  ;;  %v160_v31 = vand.u32 4294901760, %v1135_v24  ;;  %v167_v32 = vand.u32 4294901760, %v1138_v26  ;;  %v1154_v33 = vsub.f32 %v20_v7, %v50_v10  ;;  %v1156_v34 = vsub.f32 %v21_v8, %v53_v11  ;;  %s1047_s5 = scalar_lea.vmem %s714_s4, 512  ;;  %p1052_p1 = scmp.lt.s32.totalorder %s714_s4, %s714_s4 }
   0x9   :  { %v112_v35 = vand.u32 4294901760, %v1143_v27  ;;  %v154_v36 = vsub.f32 %v1129_v22, %v153_v28  ;;  %v1161_v37 = vsub.f32 %v29_v25, %v1146_v29  ;;  %v174_v38 = vand.u32 4294901760, %v1148_v30  ;;  %p1048_p0 = scmp.ne.s32.totalorder %s714_s4, %s1047_s5  ;;  %p1053_p2 = scmp.lt.s32.totalorder %s1047_s5, %s1047_s5 }
   0xa   :  { %v161_v39 = vsub.f32 %v1135_v24, %v160_v31  ;;  %v168_v40 = vsub.f32 %v1138_v26, %v167_v32  ;;  %v181_v41 = vand.u32 4294901760, %v1154_v33  ;;  %v1177_v47 = vpack.c.bf16 %v59_v20, %v56_v16 }
   0xb   :  { %935 = vmatpush3.bf16.msra.mxu1 %v1124_v19  ;;  %983 = vmatpush3.bf16.msra.mxu0 %v1124_v19  ;;  %v113_v42 = vsub.f32 %v1143_v27, %v112_v35  ;;  %v155_v43 = vand.u32 4294901760, %v154_v36  ;;  %v122_v44 = vand.u32 4294901760, %v1161_v37  ;;  %v175_v45 = vsub.f32 %v1148_v30, %v174_v38  ;;  %p1054_p3 = por %p1053_p2, %p1052_p1 }
   0xc   :  { %937 = vmatprep.subr.bf16.mxu1 %v1133_v23  ;;  %985 = vmatprep.subr.bf16.mxu0 %v1133_v23  ;;  %v162_v48 = vand.u32 4294901760, %v161_v39  ;;  %v992_v50 = vpack.c.bf16 %v160_v31, %v153_v28  ;;  %v188_v51 = vand.u32 4294901760, %v1156_v34  ;;  %v169_v54 = vand.u32 4294901760, %v168_v40 }
   0xd   :  { %v114_v49 = vand.u32 4294901760, %v113_v42  ;;  %878 = vmatprep.mubr.f32.mxu0 %v112_v35  ;;  %v123_v53 = vsub.f32 %v1161_v37, %v122_v44  ;;  %v32_v55 = vsel %vm24_vm0, %v14_v46, 0  ;;  %v1185_v56 = vsub.f32 %v22_v12, %v56_v16  ;;  %p1055_p4 = pnand %p1054_p3, %p1048_p0 }
   0xe   :  { %v944_v57 = vpack.c.bf16 %v162_v48, %v155_v43  ;;  %v176_v58 = vand.u32 4294901760, %v175_v45  ;;  %v182_v59 = vsub.f32 %v1154_v33, %v181_v41  ;;  %v189_v60 = vsub.f32 %v1156_v34, %v188_v51 }
   0xf   :  { %939 = vmatpush3.bf16.msra.mxu1 %v1133_v23  ;;  %987 = vmatpush3.bf16.msra.mxu0 %v1133_v23  ;;  %v1193_v61 = vand.u32 4294901760, %v32_v55  ;;  %v195_v62 = vand.u32 4294901760, %v1185_v56  ;;  %v1197_v63 = vsub.f32 %v1113_v13, %v59_v20  ;;  %v35_v0 = vsel %vm24_vm0, %v15_v52, 0 }
  0x10   :  { %941 = vmatprep.subr.bf16.mxu1 %v1177_v47  ;;  %989 = vmatprep.subr.bf16.mxu0 %v1177_v47  ;;  %v1200_v1 = vand.u32 4294901760, %v35_v0  ;;  %v124_v2 = vand.u32 4294901760, %v123_v53  ;;  %v948_v5 = vpack.c.bf16 %v176_v58, %v169_v54  ;;  %v996_v6 = vpack.c.bf16 %v174_v38, %v167_v32 }
  0x11   :  { %812 = vmatprep.mubr.f32.mxu1 %v114_v49  ;;  %v1203_v3 = vsub.f32 %v32_v55, %v1193_v61  ;;  %v202_v4 = vand.u32 4294901760, %v1197_v63  ;;  %v183_v7 = vand.u32 4294901760, %v182_v59  ;;  %v190_v9 = vand.u32 4294901760, %v189_v60 }
  0x12   :  { %v1209_v8 = vsub.f32 %v35_v0, %v1200_v1  ;;  %v196_v11 = vsub.f32 %v1185_v56, %v195_v62  ;;  %v1000_v16 = vpack.c.bf16 %v188_v51, %v181_v41  ;;  %v960_v36 = vpack.c.bf16 %v1135_v24, %v1129_v22 }
  0x13   :  { %943 = vmatpush3.bf16.msra.mxu1 %v1177_v47  ;;  %991 = vmatpush3.bf16.msra.mxu0 %v1177_v47  ;;  %v132_v10 = vand.u32 4294901760, %v1203_v3  ;;  %v203_v12 = vsub.f32 %v1197_v63, %v202_v4  ;;  %v952_v18 = vpack.c.bf16 %v190_v9, %v183_v7  ;;  %v1004_v35 = vpack.c.bf16 %v202_v4, %v195_v62 }
  0x14   :  { %945 = vmatprep.subr.bf16.mxu1 %v944_v57  ;;  %993 = vmatprep.subr.bf16.mxu0 %v992_v50  ;;  %v142_v13 = vand.u32 4294901760, %v1209_v8  ;;  %v197_v25 = vand.u32 4294901760, %v196_v11  ;;  %v964_v38 = vpack.c.bf16 %v1148_v30, %v1138_v26  ;;  %v968_v22 = vpack.c.bf16 %v1156_v34, %v1154_v33 }
  0x15   :  { %v133_v14 = vsub.f32 %v1203_v3, %v132_v10  ;;  %v204_v28 = vand.u32 4294901760, %v203_v12  ;;  %vm703_vm1 = vcmask 392192  }
  0x16   :  { %813 = vmatmul.mubr.f32.vlgmr.msra.gmra.mrb[0].mxu1 %v124_v2  ;;  %879 = vmatmul.mubr.f32.vlgmr.msra.gmra.mrb[0].mxu0 %v122_v44  ;;  %v143_v17 = vsub.f32 %v1209_v8, %v142_v13 }
  0x17   :  { %947 = vmatpush3.bf16.msra.mxu1 %v944_v57  ;;  %995 = vmatpush3.bf16.msra.mxu0 %v992_v50  ;;  %v134_v20 = vand.u32 4294901760, %v133_v14  ;;  %v956_v32 = vpack.c.bf16 %v204_v28, %v197_v25 }
  0x18   :  { %949 = vmatprep.subr.bf16.mxu1 %v948_v5  ;;  %997 = vmatprep.subr.bf16.mxu0 %v996_v6  ;;  %v144_v31 = vand.u32 4294901760, %v143_v17 }
  0x19   :  { %881 = vmatprep.mubr.f32.mxu0 %v132_v10  ;;  %815 = vmatprep.mubr.f32.mxu1 %v134_v20 }
  0x1a   :  { %882 = vmatmul.mubr.f32.gmra.mrb[2].mxu0 %v142_v13  ;;  %816 = vmatmul.mubr.f32.gmra.mrb[2].mxu1 %v144_v31 }
  0x1b   :  { %951 = vmatpush3.bf16.msra.mxu1 %v948_v5  ;;  %999 = vmatpush3.bf16.msra.mxu0 %v996_v6 }
  0x1c   :  { %953 = vmatprep.subr.bf16.mxu1 %v952_v18  ;;  %1001 = vmatprep.subr.bf16.mxu0 %v1000_v16 }
  0x1d   :  { %900 = vmatprep.mubr.f32.mxu0 %v1127_v21  ;;  %834 = vmatprep.mubr.f32.mxu1 %v1127_v21 }
  0x1f   :  { %955 = vmatpush3.bf16.msra.mxu1 %v952_v18  ;;  %1003 = vmatpush3.bf16.msra.mxu0 %v1000_v16 }
  0x20   :  { %957 = vmatprep.subr.bf16.mxu1 %v956_v32  ;;  %1005 = vmatprep.subr.bf16.mxu0 %v1004_v35 }
  0x23   :  { %959 = vmatpush3.bf16.msra.mxu1 %v956_v32  ;;  %1007 = vmatpush3.bf16.msra.mxu0 %v1004_v35 }
  0x24   :  { %961 = vmatprep.subr.bf16.mxu1 %v960_v36  ;;  %1009 = vmatprep.subr.bf16.mxu0 %v1118_v15 }
  0x26   :  { %835 = vmatmul.mubr.f32.vlgmr.msra.gmra.mrb[0].mxu1 %v1146_v29  ;;  %901 = vmatmul.mubr.f32.vlgmr.msra.gmra.mrb[0].mxu0 %v1146_v29 }
  0x27   :  { %963 = vmatpush3.bf16.msra.mxu1 %v960_v36  ;;  %1011 = vmatpush3.bf16.msra.mxu0 %v1118_v15  ;;  %v972_v15 = vpack.c.bf16 %v1197_v63, %v1185_v56 }
  0x28   :  { %965 = vmatprep.subr.bf16.mxu1 %v964_v38  ;;  %1013 = vmatprep.subr.bf16.mxu0 %v1124_v19 }
  0x29   :  { %837 = vmatprep.mubr.f32.mxu1 %v1193_v61  ;;  %903 = vmatprep.mubr.f32.mxu0 %v1193_v61 }
  0x2a   :  { %838 = vmatmul.mubr.f32.gmra.mrb[2].mxu1 %v1200_v1  ;;  %904 = vmatmul.mubr.f32.gmra.mrb[2].mxu0 %v1200_v1 }
  0x2b   :  { %967 = vmatpush3.bf16.msra.mxu1 %v964_v38  ;;  %1015 = vmatpush3.bf16.msra.mxu0 %v1124_v19 }
  0x2c   :  { %969 = vmatprep.subr.bf16.mxu1 %v968_v22  ;;  %1017 = vmatprep.subr.bf16.mxu0 %v1133_v23 }
  0x2d   :  { %856 = vmatprep.mubr.f32.mxu1 %v1143_v27  ;;  %922 = vmatprep.mubr.f32.mxu0 %v1127_v21 }
  0x2f   :  { %971 = vmatpush3.bf16.msra.mxu1 %v968_v22  ;;  %1019 = vmatpush3.bf16.msra.mxu0 %v1133_v23 }
  0x30   :  { %973 = vmatprep.subr.bf16.mxu1 %v972_v15  ;;  %1021 = vmatprep.subr.bf16.mxu0 %v1177_v47 }
  0x33   :  { %975 = vmatpush3.bf16.msra.mxu1 %v972_v15  ;;  %1023 = vmatpush3.bf16.msra.mxu0 %v1177_v47 }
  0x36   :  { %857 = vmatmul.mubr.f32.vlgmr.msra.gmra.mrb[0].mxu1 %v1161_v37  ;;  %923 = vmatmul.mubr.f32.vlgmr.msra.gmra.mrb[0].mxu0 %v1146_v29 }
  0x37   :  { %859 = vmatprep.mubr.f32.mxu1 %v1203_v3  ;;  %925 = vmatprep.mubr.f32.mxu0 %v1193_v61 }
  0x3a   :  { %860 = vmatmul.mubr.f32.gmra.mrb[2].mxu1 %v1209_v8  ;;  %926 = vmatmul.mubr.f32.gmra.mrb[2].mxu0 %v1200_v1 }
 0x109   :  { %v858_v19 = vpop.f32.mrb[0].mxu1  ;;  %v924_v21 = vpop.f32.mrb[0].mxu0 }
 0x10a   :  { %v1024_v23 = vadd.f32 %v924_v21, %v858_v19  ;;  %v363_v24 = vpop.f32.mrb[1].mxu1  ;;  %v681_v26 = vpop.f32.mrb[1].mxu0 }
 0x10b   :  { %v1025_v27 = vadd.f32 %v681_v26, %v363_v24 }
 0x10c   :  { %705 = vst.msk [vmem:[#allocation2 + $0x8] sm:$0xff] %vm703_vm1, %v1024_v23 }
 0x10d   :  { %704 = vst.msk [vmem:[#allocation2] sm:$0xff] %vm703_vm1, %v1025_v27  ;;  %v861_v29 = vpop.f32.mrb[2].mxu1  ;;  %v927_v30 = vpop.f32.mrb[2].mxu0 }
 0x10e   :  { %v1026_v33 = vadd.f32 %v927_v30, %v861_v29  ;;  %v377_v34 = vpop.f32.mrb[3].mxu1  ;;  %v693_v37 = vpop.f32.mrb[3].mxu0 }
 0x10f   :  { %v1027_v39 = vadd.f32 %v693_v37, %v377_v34 }
 0x110   :  { %707 = vst.msk [vmem:[#allocation2 + $0x18] sm:$0xff] %vm703_vm1, %v1026_v33 }
 0x111   :  { %706 = vst.msk [vmem:[#allocation2 + $0x10] sm:$0xff] %vm703_vm1, %v1027_v39 }
 0x112   :  { %1058 = shalt.err (!%p1055_p4)
}
 0x113   :  { %s1059_s8 = scalar_lea.hbm %s1267_s2, 512 }
 0x114   :  { %p1060_p5 = scmp.ne.s32.totalorder %s1267_s2, %s1059_s8  ;;  %p1063_p6 = scmp.lt.u32.totalorder %s1059_s8, %s1267_s2 }
 0x116   :  { %p1065_p7 = pnand %p1063_p6, %p1060_p5 }
 0x118   :  { %1068 = shalt.err (!%p1065_p7)
}
 0x119   :  { %s1072_s13 = smov 128   ;;  %s1073_s14 = smov 8  }
 0x11a   :  { %719 = dma.vmem_to_hbm [thread:$0]  %s714_s4, 512, %s1267_s2, [#allocation3], %s1072_s13, %s1072_s13, %s1073_s14  }
 0x11b   :  { %1069 = dma.done.wait [#allocation3], 512  }
 0x11c   :  { %1070 = vsyncadd [#allocation3], 4294966784 }
 0x11d   :  { %723 = vsyncpa [#allocation3], 1 }

</bundles_post_ra>
